<compile_context>
chip_gen: v7x
topology: tpu7x:2x2x1
jax: 0.10.0
libtpu: 0.0.40
codegen_flags: <defaults>
</compile_context>

<pallas_src>
import jax
import jax.numpy as jnp
from jax.experimental import pallas as pl
from jax.experimental.pallas import tpu as pltpu

_DP = 128  # packed lane width (one vreg row) used throughout the kernel


def _round_up(a, b):
    return ((a + b - 1) // b) * b


def _make_cvp_kernel(mm_dtype):
    """Fused  tf  = relu(relu(x  @ W1 + b1) @ W2 + b2)
              rtf = relu(relu(tf @ W3 + b3) @ W4 + b4)
    on token-packed 128-lane rows (block-diagonal weights).  Matmul operands
    in `mm_dtype`, accumulate + bias + ReLU in f32, activations recast to
    `mm_dtype` right away so no f32 intermediates are carried."""

    def kernel(x_ref, w1_ref, w2_ref, w3_ref, w4_ref, b_ref, tf_ref, rtf_ref):
        x = x_ref[...].astype(mm_dtype)          # no-op when already mm_dtype
        b = b_ref[...]                           # (8, 128) f32; rows 0..3 used

        def fc(inp, w_ref, brow):
            acc = jnp.dot(inp, w_ref[...], preferred_element_type=jnp.float32)
            return jnp.maximum(acc + b[brow:brow + 1, :], 0.0).astype(mm_dtype)

        # transform_module.fc_transform
        h1 = fc(x, w1_ref, 0)
        tf = fc(h1, w2_ref, 1)
        tf_ref[...] = tf.astype(tf_ref.dtype)

        # retransform_module.fc_transform (applied to transformed features)
        h2 = fc(tf, w3_ref, 2)
        rtf = fc(h2, w4_ref, 3)
        rtf_ref[...] = rtf.astype(rtf_ref.dtype)

    return kernel


def cycled_view_projection(x, params, *, tm=1024, matmul_dtype=jnp.bfloat16,
                           out_dtype=None):
    """x: [B, C, H, W] with H*W == dim*dim.  Returns (transform_feature,
    retransform_features), both [B, C, H, W] — same semantics as the torch
    CycledViewProjection forward."""
    B, C, H, W = x.shape
    D = H * W
    assert D <= _DP and _DP % D == 0, "token width must divide the 128-lane row"
    N = B * C
    pack = _DP // D                       # tokens packed per 128-lane row

    mm_dtype = jnp.float32 if matmul_dtype is None else matmul_dtype
    out_dtype = x.dtype if out_dtype is None else out_dtype

    # ---- row tiling over packed rows: cdiv grid, >=2 steps when possible ----
    rows = -(-N // pack)                  # packed rows carrying real tokens
    rows128 = _round_up(rows, 128)
    tm_eff = max(128, min((tm // 128) * 128, rows128, 2048))
    if rows128 >= 256 and rows128 // tm_eff < 2:
        # ensure at least two grid steps so both v7x TensorCores get work
        tm_eff = _round_up(rows128 // 2, 128)
    rows_pad = _round_up(rows, tm_eff)
    grid = rows_pad // tm_eff

    # ---- pack x: (B,C,H,W) -> (N, D) tokens -> `pack` tokens per 128 lanes ---
    x2 = x.reshape(N, D)
    if jnp.dtype(x2.dtype) != jnp.dtype(mm_dtype):
        x2 = x2.astype(mm_dtype)          # cast folded into the packing copy
    tok_pad = rows_pad * pack - N
    if tok_pad:
        x2 = jnp.pad(x2, ((0, tok_pad), (0, 0)))
    xp = x2.reshape(rows_pad, _DP)        # free row-major view

    def pack_w(w):   # torch (out,in) -> (in,out), block-diagonal (128,128)
        wt = w.T.astype(mm_dtype)
        bd = jnp.zeros((_DP, _DP), mm_dtype)
        for i in range(pack):             # static tiny Python loop
            bd = bd.at[i * D:(i + 1) * D, i * D:(i + 1) * D].set(wt)
        return bd

    w1 = pack_w(params["t_w1"])
    w2 = pack_w(params["t_w2"])
    w3 = pack_w(params["r_w1"])
    w4 = pack_w(params["r_w2"])

    # The 4 biases, each tiled across the packed tokens, in one (8,128) tile.
    b_stack = jnp.stack([jnp.tile(params[k].astype(jnp.float32), pack)
                         for k in ("t_b1", "t_b2", "r_b1", "r_b2")])
    b_stack = jnp.pad(b_stack, ((0, 4), (0, 0)))

    row_spec = pl.BlockSpec((tm_eff, _DP), lambda i: (i, 0))
    mat_spec = pl.BlockSpec((_DP, _DP), lambda i: (0, 0))
    bias_spec = pl.BlockSpec((8, _DP), lambda i: (0, 0))

    mm_size = jnp.dtype(mm_dtype).itemsize
    out_size = jnp.dtype(out_dtype).itemsize
    cost = pl.CostEstimate(
        flops=2 * rows_pad * _DP * _DP * 4,
        transcendentals=0,
        bytes_accessed=(rows_pad * _DP * mm_size            # x
                        + 4 * _DP * _DP * mm_size           # weights
                        + 8 * _DP * 4                       # biases
                        + 2 * rows_pad * _DP * out_size),   # tf, rtf
    )

    tf_p, rtf_p = pl.pallas_call(
        _make_cvp_kernel(mm_dtype),
        out_shape=(jax.ShapeDtypeStruct((rows_pad, _DP), out_dtype),
                   jax.ShapeDtypeStruct((rows_pad, _DP), out_dtype)),
        grid_spec=pltpu.PrefetchScalarGridSpec(
            num_scalar_prefetch=0,
            grid=(grid,),
            in_specs=[row_spec,
                      mat_spec, mat_spec, mat_spec, mat_spec,
                      bias_spec],
            out_specs=[row_spec, row_spec],
        ),
        compiler_params=pltpu.CompilerParams(
            dimension_semantics=("parallel",)),
        cost_estimate=cost,
    )(xp, w1, w2, w3, w4, b_stack)

    def unpack(o):
        o = o.reshape(rows_pad * pack, D)
        if tok_pad:
            o = o[:N]                     # drop garbage (relu(bias)) token pads
        return o.reshape(B, C, H, W)

    return unpack(tf_p), unpack(rtf_p)


def init_params(key, dim=8, dtype=jnp.float32):
    """Deterministic synthetic init for the 4 Linear(dim*dim, dim*dim) layers
    (torch (out, in) weight convention)."""
    D = dim * dim
    keys = jax.random.split(key, 8)
    scale = 1.0 / jnp.sqrt(D)

    def lin(kw, kb):
        w = jax.random.uniform(kw, (D, D), dtype, -scale, scale)
        b = jax.random.uniform(kb, (D,), dtype, -scale, scale)
        return w, b

    t_w1, t_b1 = lin(keys[0], keys[1])
    t_w2, t_b2 = lin(keys[2], keys[3])
    r_w1, r_b1 = lin(keys[4], keys[5])
    r_w2, r_b2 = lin(keys[6], keys[7])
    return dict(t_w1=t_w1, t_b1=t_b1, t_w2=t_w2, t_b2=t_b2,
                r_w1=r_w1, r_b1=r_b1, r_w2=r_w2, r_b2=r_b2)


def _reference(x, p):
    """Pure-JAX f32 reference mirroring the torch forward."""
    B, C, H, W = x.shape
    D = H * W
    v = x.reshape(B, C, D)

    def fc(v, w1, b1, w2, b2):
        h = jnp.maximum(v @ w1.T + b1, 0.0)
        return jnp.maximum(h @ w2.T + b2, 0.0)

    tf = fc(v, p["t_w1"], p["t_b1"], p["t_w2"], p["t_b2"]).reshape(B, C, H, W)
    rtf = fc(tf.reshape(B, C, D),
             p["r_w1"], p["r_b1"], p["r_w2"], p["r_b2"]).reshape(B, C, H, W)
    return tf, rtf


if __name__ == "__main__":
    dim = 8                        # in_dim of CycledViewProjection
    B, C, H, W = 2, 4, dim, dim    # module requires H*W == dim*dim

    key = jax.random.PRNGKey(0)
    kx, kp, kx2 = jax.random.split(key, 3)
    x = jax.random.normal(kx, (B, C, H, W), jnp.float32)
    params = init_params(kp, dim=dim)

    tf_ref, rtf_ref = _reference(x, params)

    # 1) exact f32 matmul path (bit-accurate validation).
    tf32, rtf32 = cycled_view_projection(x, params, matmul_dtype=None)
    jax.block_until_ready((tf32, rtf32))
    assert tf32.shape == (B, C, H, W) and rtf32.shape == (B, C, H, W)
    assert jnp.allclose(tf32, tf_ref, atol=1e-4, rtol=1e-4)
    assert jnp.allclose(rtf32, rtf_ref, atol=1e-4, rtol=1e-4)

    # 2) default bf16-operand / f32-accumulate production path.
    tfb, rtfb = cycled_view_projection(x, params)
    jax.block_until_ready((tfb, rtfb))
    assert jnp.allclose(tfb, tf_ref, atol=5e-2, rtol=5e-2)
    assert jnp.allclose(rtfb, rtf_ref, atol=5e-2, rtol=5e-2)

    # 3) bf16 outputs (halves output write traffic) — dtype + loose tolerance.
    tfo, rtfo = cycled_view_projection(x, params, out_dtype=jnp.bfloat16)
    jax.block_until_ready((tfo, rtfo))
    assert tfo.dtype == jnp.bfloat16 and rtfo.dtype == jnp.bfloat16
    assert jnp.allclose(tfo.astype(jnp.float32), tf_ref, atol=7e-2, rtol=7e-2)
    assert jnp.allclose(rtfo.astype(jnp.float32), rtf_ref, atol=7e-2, rtol=7e-2)

    # 4) odd token count (B*C = 15): exercises the padded token slot in the
    #    last packed row plus the cdiv row grid with remainder rows.
    x3 = jax.random.normal(kx2, (3, 5, dim, dim), jnp.float32)
    tf3, rtf3 = cycled_view_projection(x3, params, matmul_dtype=None)
    jax.block_until_ready((tf3, rtf3))
    tf3_ref, rtf3_ref = _reference(x3, params)
    assert jnp.allclose(tf3, tf3_ref, atol=1e-4, rtol=1e-4)
    assert jnp.allclose(rtf3, rtf3_ref, atol=1e-4, rtol=1e-4)

    print("KERNEL_OK")
</pallas_src>

<mosaic_0001>
module attributes {stable_mosaic.version = 11 : i64} {
  func.func @kernel(%arg0: i32, %arg1: memref<128x128xf32, #tpu.memory_space<vmem>>, %arg2: memref<128x128xf32, #tpu.memory_space<vmem>>, %arg3: memref<128x128xf32, #tpu.memory_space<vmem>>, %arg4: memref<128x128xf32, #tpu.memory_space<vmem>>, %arg5: memref<128x128xf32, #tpu.memory_space<vmem>>, %arg6: memref<8x128xf32, #tpu.memory_space<vmem>>, %arg7: memref<128x128xf32, #tpu.memory_space<vmem>>, %arg8: memref<128x128xf32, #tpu.memory_space<vmem>>) attributes {dimension_semantics = [#tpu.dimension_semantics<parallel>], iteration_bounds = array<i64: 1>, scalar_prefetch = 0 : i64, scratch_operands = 0 : i64, tpu.core_type = #tpu.core_type<tc>, window_params = [{transform_indices = @transform_0, window_bounds = array<i64: 128, 128>}, {pipeline_mode = #tpu.pipeline_mode<synchronous>, transform_indices = @transform_1, window_bounds = array<i64: 128, 128>}, {pipeline_mode = #tpu.pipeline_mode<synchronous>, transform_indices = @transform_2, window_bounds = array<i64: 128, 128>}, {pipeline_mode = #tpu.pipeline_mode<synchronous>, transform_indices = @transform_3, window_bounds = array<i64: 128, 128>}, {pipeline_mode = #tpu.pipeline_mode<synchronous>, transform_indices = @transform_4, window_bounds = array<i64: 128, 128>}, {pipeline_mode = #tpu.pipeline_mode<synchronous>, transform_indices = @transform_5, window_bounds = array<i64: 8, 128>}, {transform_indices = @transform_6, window_bounds = array<i64: 128, 128>}, {transform_indices = @transform_7, window_bounds = array<i64: 128, 128>}]} {
    %c0 = arith.constant 0 : index
    %c0_0 = arith.constant 0 : index
    %0 = vector.load %arg1[%c0, %c0_0] : memref<128x128xf32, #tpu.memory_space<vmem>>, vector<128x128xf32>
    %c0_1 = arith.constant 0 : index
    %c0_2 = arith.constant 0 : index
    %1 = vector.load %arg6[%c0_1, %c0_2] : memref<8x128xf32, #tpu.memory_space<vmem>>, vector<8x128xf32>
    %c0_3 = arith.constant 0 : index
    %c0_4 = arith.constant 0 : index
    %2 = vector.load %arg2[%c0_3, %c0_4] : memref<128x128xf32, #tpu.memory_space<vmem>>, vector<128x128xf32>
    %cst = arith.constant dense<0.000000e+00> : vector<128x128xf32>
    %3 = tpu.matmul %0, %2, %cst {dimension_numbers = #tpu.dot_dimension_numbers<[1], [0], [0], [1], [0, 0, 1, 1], [], []>} : vector<128x128xf32>, vector<128x128xf32>, vector<128x128xf32> -> vector<128x128xf32>
    %4 = vector.extract_strided_slice %1 {offsets = [0, 0], sizes = [1, 128], strides = [1, 1]} : vector<8x128xf32> to vector<1x128xf32>
    %5 = vector.broadcast %4 : vector<1x128xf32> to vector<128x128xf32>
    %6 = arith.addf %3, %5 : vector<128x128xf32>
    %cst_5 = arith.constant 0.000000e+00 : f32
    %7 = vector.broadcast %cst_5 : f32 to vector<128x128xf32>
    %8 = arith.maximumf %6, %7 : vector<128x128xf32>
    %c0_6 = arith.constant 0 : index
    %c0_7 = arith.constant 0 : index
    %9 = vector.load %arg3[%c0_6, %c0_7] : memref<128x128xf32, #tpu.memory_space<vmem>>, vector<128x128xf32>
    %cst_8 = arith.constant dense<0.000000e+00> : vector<128x128xf32>
    %10 = tpu.matmul %8, %9, %cst_8 {dimension_numbers = #tpu.dot_dimension_numbers<[1], [0], [0], [1], [0, 0, 1, 1], [], []>} : vector<128x128xf32>, vector<128x128xf32>, vector<128x128xf32> -> vector<128x128xf32>
    %11 = vector.extract_strided_slice %1 {offsets = [1, 0], sizes = [1, 128], strides = [1, 1]} : vector<8x128xf32> to vector<1x128xf32>
    %12 = vector.broadcast %11 : vector<1x128xf32> to vector<128x128xf32>
    %13 = arith.addf %10, %12 : vector<128x128xf32>
    %cst_9 = arith.constant 0.000000e+00 : f32
    %14 = vector.broadcast %cst_9 : f32 to vector<128x128xf32>
    %15 = arith.maximumf %13, %14 : vector<128x128xf32>
    %c0_10 = arith.constant 0 : index
    %c0_11 = arith.constant 0 : index
    %16 = vector.load %arg7[%c0_10, %c0_11] : memref<128x128xf32, #tpu.memory_space<vmem>>, vector<128x128xf32>
    tpu.vector_store %arg7[%c0_10, %c0_11], %15 {strides = array<i32>} : memref<128x128xf32, #tpu.memory_space<vmem>>, vector<128x128xf32>,
    %c0_12 = arith.constant 0 : index
    %c0_13 = arith.constant 0 : index
    %17 = vector.load %arg4[%c0_12, %c0_13] : memref<128x128xf32, #tpu.memory_space<vmem>>, vector<128x128xf32>
    %cst_14 = arith.constant dense<0.000000e+00> : vector<128x128xf32>
    %18 = tpu.matmul %15, %17, %cst_14 {dimension_numbers = #tpu.dot_dimension_numbers<[1], [0], [0], [1], [0, 0, 1, 1], [], []>} : vector<128x128xf32>, vector<128x128xf32>, vector<128x128xf32> -> vector<128x128xf32>
    %19 = vector.extract_strided_slice %1 {offsets = [2, 0], sizes = [1, 128], strides = [1, 1]} : vector<8x128xf32> to vector<1x128xf32>
    %20 = vector.broadcast %19 : vector<1x128xf32> to vector<128x128xf32>
    %21 = arith.addf %18, %20 : vector<128x128xf32>
    %cst_15 = arith.constant 0.000000e+00 : f32
    %22 = vector.broadcast %cst_15 : f32 to vector<128x128xf32>
    %23 = arith.maximumf %21, %22 : vector<128x128xf32>
    %c0_16 = arith.constant 0 : index
    %c0_17 = arith.constant 0 : index
    %24 = vector.load %arg5[%c0_16, %c0_17] : memref<128x128xf32, #tpu.memory_space<vmem>>, vector<128x128xf32>
    %cst_18 = arith.constant dense<0.000000e+00> : vector<128x128xf32>
    %25 = tpu.matmul %23, %24, %cst_18 {dimension_numbers = #tpu.dot_dimension_numbers<[1], [0], [0], [1], [0, 0, 1, 1], [], []>} : vector<128x128xf32>, vector<128x128xf32>, vector<128x128xf32> -> vector<128x128xf32>
    %26 = vector.extract_strided_slice %1 {offsets = [3, 0], sizes = [1, 128], strides = [1, 1]} : vector<8x128xf32> to vector<1x128xf32>
    %27 = vector.broadcast %26 : vector<1x128xf32> to vector<128x128xf32>
    %28 = arith.addf %25, %27 : vector<128x128xf32>
    %cst_19 = arith.constant 0.000000e+00 : f32
    %29 = vector.broadcast %cst_19 : f32 to vector<128x128xf32>
    %30 = arith.maximumf %28, %29 : vector<128x128xf32>
    %c0_20 = arith.constant 0 : index
    %c0_21 = arith.constant 0 : index
    %31 = vector.load %arg8[%c0_20, %c0_21] : memref<128x128xf32, #tpu.memory_space<vmem>>, vector<128x128xf32>
    tpu.vector_store %arg8[%c0_20, %c0_21], %30 {strides = array<i32>} : memref<128x128xf32, #tpu.memory_space<vmem>>, vector<128x128xf32>,
    return
  }
  func.func @transform_0(%arg0: i32) -> (i32, i32) {
    %c0_i32 = arith.constant 0 : i32
    %c0_i32_0 = arith.constant 0 : i32
    return %arg0, %c0_i32 : i32, i32
  }
  func.func @transform_1(%arg0: i32) -> (i32, i32) {
    %c0_i32 = arith.constant 0 : i32
    %c0_i32_0 = arith.constant 0 : i32
    %c0_i32_1 = arith.constant 0 : i32
    return %c0_i32, %c0_i32_0 : i32, i32
  }
  func.func @transform_2(%arg0: i32) -> (i32, i32) {
    %c0_i32 = arith.constant 0 : i32
    %c0_i32_0 = arith.constant 0 : i32
    %c0_i32_1 = arith.constant 0 : i32
    return %c0_i32, %c0_i32_0 : i32, i32
  }
  func.func @transform_3(%arg0: i32) -> (i32, i32) {
    %c0_i32 = arith.constant 0 : i32
    %c0_i32_0 = arith.constant 0 : i32
    %c0_i32_1 = arith.constant 0 : i32
    return %c0_i32, %c0_i32_0 : i32, i32
  }
  func.func @transform_4(%arg0: i32) -> (i32, i32) {
    %c0_i32 = arith.constant 0 : i32
    %c0_i32_0 = arith.constant 0 : i32
    %c0_i32_1 = arith.constant 0 : i32
    return %c0_i32, %c0_i32_0 : i32, i32
  }
  func.func @transform_5(%arg0: i32) -> (i32, i32) {
    %c0_i32 = arith.constant 0 : i32
    %c0_i32_0 = arith.constant 0 : i32
    %c0_i32_1 = arith.constant 0 : i32
    return %c0_i32, %c0_i32_0 : i32, i32
  }
  func.func @transform_6(%arg0: i32) -> (i32, i32) {
    %c0_i32 = arith.constant 0 : i32
    %c0_i32_0 = arith.constant 0 : i32
    return %arg0, %c0_i32 : i32, i32
  }
  func.func @transform_7(%arg0: i32) -> (i32, i32) {
    %c0_i32 = arith.constant 0 : i32
    %c0_i32_0 = arith.constant 0 : i32
    return %arg0, %c0_i32 : i32, i32
  }
}

</mosaic_0001>

<bundles_post_ra>
// kernel: tpu_custom_call.1
= control target key start
LH: loop header
LB: loop body
LE: loop exit
PB: predicated region body
PF: predicated region fallthrough
CT: control target
= control target key end

     0   :  { %13 = vsyncpa [#allocation3], 0  ;;  %s1757_s0 = inlined_call_operand.hbm [shape: f32[128,128], index: 0, kind: input, shape index: {}]   ;;  %s1758_s1 = inlined_call_operand.hbm [shape: f32[128,128], index: 1, kind: input, shape index: {}]   ;;  %s1759_s2 = inlined_call_operand.hbm [shape: f32[128,128], index: 2, kind: input, shape index: {}]   ;;  %s1760_s3 = inlined_call_operand.hbm [shape: f32[128,128], index: 3, kind: input, shape index: {}]   ;;  %s1761_s4 = inlined_call_operand.hbm [shape: f32[128,128], index: 4, kind: input, shape index: {}]   ;;  %s1762_s5 = inlined_call_operand.vmem [shape: f32[8,128], index: 5, kind: input, shape index: {}]   ;;  %s1763_s6 = inlined_call_operand.hbm [shape: f32[128,128], index: 6, kind: output, shape index: {0}]   ;;  %s1764_s7 = inlined_call_operand.hbm [shape: f32[128,128], index: 7, kind: output, shape index: {1}]  }
   0x1   :  { %14 = vsyncpa [#allocation6], 0 }
   0x2   :  { %15 = vsyncpa [#allocation9], 0 }
   0x3   :  { %16 = vsyncpa [#allocation4], 0 }
   0x4   :  { %17 = vsyncpa [#allocation13], 0  ;;  %s1556_s24 = smov [#allocation5]   ;;  %s1557_s26 = smov [#allocation8]  }
   0x5   :  { %s35_s25 = sshll.u32 %s1556_s24, 4  ;;  %s59_s27 = sshll.u32 %s1557_s26, 4  ;;  %s36_s25 = int_to_ptr.vmem [resolvable:$true] %s35_s25  ;;  %s1605_s27 = int_to_ptr.vmem [resolvable:$true] %s59_s27 }
   0x6   :  { %s1392_s30 = scalar_lea.hbm %s1758_s1, 2048 }
   0x7   :  { %p1393_p0 = scmp.ne.s32.totalorder %s1758_s1, %s1392_s30  ;;  %p1396_p1 = scmp.lt.u32.totalorder %s1392_s30, %s1758_s1 }
   0x9   :  { %p1398_p2 = pnand %p1396_p1, %p1393_p0 }
   0xb   :  { %1401 = shalt.err (!%p1398_p2)
}
   0xc   :  { %s1402_s12 = scalar_lea.vmem %s36_s25, 2048  ;;  %p1407_p4 = scmp.lt.s32.totalorder %s36_s25, %s36_s25 }
   0xd   :  { %p1403_p3 = scmp.ne.s32.totalorder %s36_s25, %s1402_s12  ;;  %p1408_p5 = scmp.lt.s32.totalorder %s1402_s12, %s1402_s12 }
   0xf   :  { %p1409_p6 = por %p1408_p5, %p1407_p4 }
  0x11   :  { %p1410_p7 = pnand %p1409_p6, %p1403_p3 }
  0x13   :  { %1413 = shalt.err (!%p1410_p7)
}
  0x14   :  { %s1558_s13 = smov 128   ;;  %s1559_s14 = smov 8  }
  0x15   :  { %41 = dma.hbm_to_vmem [thread:$0]  %s1758_s1, 2048, %s36_s25, [#allocation6], %s1558_s13, %s1558_s13, %s1559_s14  }
  0x16   :  { %s1414_s19 = scalar_lea.hbm %s1760_s3, 2048 }
  0x17   :  { %p1415_p8 = scmp.ne.s32.totalorder %s1760_s3, %s1414_s19  ;;  %p1418_p9 = scmp.lt.u32.totalorder %s1414_s19, %s1760_s3 }
  0x19   :  { %p1420_p10 = pnand %p1418_p9, %p1415_p8 }
  0x1b   :  { %1423 = shalt.err (!%p1420_p10)
}
  0x1c   :  { %s1424_s24 = scalar_lea.vmem %s1605_s27, 2048  ;;  %p1429_p12 = scmp.lt.s32.totalorder %s1605_s27, %s1605_s27 }
  0x1d   :  { %p1425_p11 = scmp.ne.s32.totalorder %s1605_s27, %s1424_s24  ;;  %p1430_p13 = scmp.lt.s32.totalorder %s1424_s24, %s1424_s24 }
  0x1f   :  { %p1431_p0 = por %p1430_p13, %p1429_p12 }
  0x21   :  { %p1432_p1 = pnand %p1431_p0, %p1425_p11 }
  0x23   :  { %1435 = shalt.err (!%p1432_p1)
}
  0x24   :  { %65 = dma.hbm_to_vmem [thread:$0]  %s1760_s3, 2048, %s1605_s27, [#allocation9], %s1558_s13, %s1558_s13, %s1559_s14  }
  0x25   :  { %s1560_s26 = smov [#allocation2]   ;;  %s1561_s29 = smov [#allocation7]  }
  0x26   :  { %s23_s28 = sshll.u32 %s1560_s26, 4  ;;  %s47_s30 = sshll.u32 %s1561_s29, 4  ;;  %s24_s28 = int_to_ptr.vmem [resolvable:$true] %s23_s28  ;;  %s1642_s30 = int_to_ptr.vmem [resolvable:$true] %s47_s30 }
  0x27   :  { %s1436_s10 = scalar_lea.hbm %s1757_s0, 2048 }
  0x28   :  { %p1437_p2 = scmp.ne.s32.totalorder %s1757_s0, %s1436_s10  ;;  %p1440_p3 = scmp.lt.u32.totalorder %s1436_s10, %s1757_s0 }
  0x2a   :  { %p1442_p4 = pnand %p1440_p3, %p1437_p2 }
  0x2c   :  { %1445 = shalt.err (!%p1442_p4)
}
  0x2d   :  { %s1446_s3 = scalar_lea.vmem %s24_s28, 2048  ;;  %p1451_p6 = scmp.lt.s32.totalorder %s24_s28, %s24_s28 }
  0x2e   :  { %p1447_p5 = scmp.ne.s32.totalorder %s24_s28, %s1446_s3  ;;  %p1452_p7 = scmp.lt.s32.totalorder %s1446_s3, %s1446_s3 }
  0x30   :  { %p1453_p8 = por %p1452_p7, %p1451_p6 }
  0x32   :  { %p1454_p9 = pnand %p1453_p8, %p1447_p5 }
  0x34   :  { %1457 = shalt.err (!%p1454_p9)
}
  0x35   :  { %29 = dma.hbm_to_vmem [thread:$0]  %s1757_s0, 2048, %s24_s28, [#allocation3], %s1558_s13, %s1558_s13, %s1559_s14  }
  0x36   :  { %s1458_s20 = scalar_lea.hbm %s1759_s2, 2048 }
  0x37   :  { %p1459_p10 = scmp.ne.s32.totalorder %s1759_s2, %s1458_s20  ;;  %p1462_p11 = scmp.lt.u32.totalorder %s1458_s20, %s1759_s2 }
  0x39   :  { %p1464_p12 = pnand %p1462_p11, %p1459_p10 }
  0x3b   :  { %1467 = shalt.err (!%p1464_p12)
}
  0x3c   :  { %s1468_s1 = scalar_lea.vmem %s1642_s30, 2048  ;;  %p1473_p0 = scmp.lt.s32.totalorder %s1642_s30, %s1642_s30 }
  0x3d   :  { %p1469_p13 = scmp.ne.s32.totalorder %s1642_s30, %s1468_s1  ;;  %p1474_p1 = scmp.lt.s32.totalorder %s1468_s1, %s1468_s1 }
  0x3f   :  { %p1475_p2 = por %p1474_p1, %p1473_p0 }
  0x41   :  { %p1476_p3 = pnand %p1475_p2, %p1469_p13 }
  0x43   :  { %1479 = shalt.err (!%p1476_p3)
}
  0x44   :  { %53 = dma.hbm_to_vmem [thread:$0]  %s1759_s2, 2048, %s1642_s30, [#allocation6], %s1558_s13, %s1558_s13, %s1559_s14  }
  0x45   :  { %s1562_s26 = smov [#allocation10]   ;;  %s1480_s9 = scalar_lea.hbm %s1761_s4, 2048 }
  0x46   :  { %s71_s28 = sshll.u32 %s1562_s26, 4  ;;  %p1481_p4 = scmp.ne.s32.totalorder %s1761_s4, %s1480_s9  ;;  %s72_s28 = int_to_ptr.vmem [resolvable:$true] %s71_s28 }
  0x47   :  { %p1484_p5 = scmp.lt.u32.totalorder %s1480_s9, %s1761_s4 }
  0x49   :  { %p1486_p6 = pnand %p1484_p5, %p1481_p4 }
  0x4b   :  { %1489 = shalt.err (!%p1486_p6)
}
  0x4c   :  { %s1490_s16 = scalar_lea.vmem %s72_s28, 2048  ;;  %p1495_p8 = scmp.lt.s32.totalorder %s72_s28, %s72_s28 }
  0x4d   :  { %p1491_p7 = scmp.ne.s32.totalorder %s72_s28, %s1490_s16  ;;  %p1496_p9 = scmp.lt.s32.totalorder %s1490_s16, %s1490_s16 }
  0x4f   :  { %p1497_p10 = por %p1496_p9, %p1495_p8 }
  0x51   :  { %p1498_p11 = pnand %p1497_p10, %p1491_p7 }
  0x53   :  { %1501 = shalt.err (!%p1498_p11)
}
  0x54   :  { %77 = dma.hbm_to_vmem [thread:$0]  %s1761_s4, 2048, %s72_s28, [#allocation9], %s1558_s13, %s1558_s13, %s1559_s14  }
  0x55   :  { %1546 = dma.done.wait [#allocation3], 2048  }
  0x56   :  { %1547 = vsyncadd [#allocation3], 4294965248 }
  0x57   :  { %1548 = dma.done.wait [#allocation6], 4096  }
  0x58   :  { %1549 = vsyncadd [#allocation6], 4294963200 }
  0x59   :  { %1550 = dma.done.wait [#allocation9], 4096  }
  0x5a   :  { %1551 = vsyncadd [#allocation9], 4294963200  ;;  %v112_v0 = vld [vmem:[#allocation5] sm:$0xff]  ;;  %v113_v1 = vld [vmem:[#allocation5 + $0x8] sm:$0xff] }
  0x5b   :  { %v114_v2 = vld [vmem:[#allocation5 + $0x10] sm:$0xff]  ;;  %v1255_v3 = vpack.c.bf16 %v113_v1, %v112_v0  ;;  %v115_v4 = vld [vmem:[#allocation5 + $0x18] sm:$0xff]  ;;  %v116_v6 = vld [vmem:[#allocation5 + $0x20] sm:$0xff] }
  0x5c   :  { %v1259_v5 = vpack.c.bf16 %v115_v4, %v114_v2  ;;  %v117_v7 = vld [vmem:[#allocation5 + $0x28] sm:$0xff]  ;;  %v95_v9 = vld [vmem:[#allocation2] sm:$0xff]  ;;  %v118_v10 = vld [vmem:[#allocation5 + $0x30] sm:$0xff] }
  0x5d   :  { %1256 = vmatprep.subr.bf16.mxu0 %v1255_v3  ;;  %v1263_v8 = vpack.c.bf16 %v117_v7, %v116_v6  ;;  %v119_v11 = vld [vmem:[#allocation5 + $0x38] sm:$0xff]  ;;  %1063 = vmatprep.mubr.f32.mxu0 %v95_v9  ;;  %v120_v13 = vld [vmem:[#allocation5 + $0x40] sm:$0xff]  ;;  %v121_v14 = vld [vmem:[#allocation5 + $0x48] sm:$0xff] }
  0x5e   :  { %1258 = vmatpush3.bf16.msra.mxu0 %v1255_v3  ;;  %v1267_v12 = vpack.c.bf16 %v119_v11, %v118_v10  ;;  %v293_v15 = vld [vmem:[#allocation7] sm:$0xff]  ;;  %v294_v16 = vld [vmem:[#allocation7 + $0x8] sm:$0xff]  ;;  %v295_v17 = vld [vmem:[#allocation7 + $0x10] sm:$0xff]  ;;  %v1271_v21 = vpack.c.bf16 %v121_v14, %v120_v13 }
  0x5f   :  { %1260 = vmatprep.subr.bf16.mxu0 %v1259_v5  ;;  %v296_v18 = vld [vmem:[#allocation7 + $0x18] sm:$0xff]  ;;  %v1287_v19 = vpack.c.bf16 %v294_v16, %v293_v15  ;;  %v297_v22 = vld [vmem:[#allocation7 + $0x20] sm:$0xff]  ;;  %v298_v23 = vld [vmem:[#allocation7 + $0x28] sm:$0xff] }
  0x60   :  { %v1291_v20 = vpack.c.bf16 %v296_v18, %v295_v17  ;;  %v122_v24 = vld [vmem:[#allocation5 + $0x50] sm:$0xff]  ;;  %v123_v25 = vld [vmem:[#allocation5 + $0x58] sm:$0xff]  ;;  %v1295_v26 = vpack.c.bf16 %v298_v23, %v297_v22  ;;  %v124_v30 = vld [vmem:[#allocation5 + $0x60] sm:$0xff] }
  0x61   :  { %1288 = vmatprep.subr.bf16.mxu1 %v1287_v19  ;;  %v1275_v27 = vpack.c.bf16 %v123_v25, %v122_v24  ;;  %v299_v28 = vld [vmem:[#allocation7 + $0x30] sm:$0xff]  ;;  %v300_v29 = vld [vmem:[#allocation7 + $0x38] sm:$0xff]  ;;  %v125_v31 = vld [vmem:[#allocation5 + $0x68] sm:$0xff] }
  0x62   :  { %1262 = vmatpush3.bf16.msra.mxu0 %v1259_v5  ;;  %1290 = vmatpush3.bf16.msra.mxu1 %v1287_v19  ;;  %v1299_v32 = vpack.c.bf16 %v300_v29, %v299_v28  ;;  %v1279_v33 = vpack.c.bf16 %v125_v31, %v124_v30  ;;  %v301_v34 = vld [vmem:[#allocation7 + $0x40] sm:$0xff]  ;;  %v302_v35 = vld [vmem:[#allocation7 + $0x48] sm:$0xff]  ;;  %v126_v36 = vld [vmem:[#allocation5 + $0x70] sm:$0xff] }
  0x63   :  { %1264 = vmatprep.subr.bf16.mxu0 %v1263_v8  ;;  %1292 = vmatprep.subr.bf16.mxu1 %v1291_v20  ;;  %v127_v37 = vld [vmem:[#allocation5 + $0x78] sm:$0xff]  ;;  %v1303_v38 = vpack.c.bf16 %v302_v35, %v301_v34  ;;  %v303_v40 = vld [vmem:[#allocation7 + $0x50] sm:$0xff]  ;;  %v305_v43 = vld [vmem:[#allocation7 + $0x60] sm:$0xff] }
  0x64   :  { %v1283_v39 = vpack.c.bf16 %v127_v37, %v126_v36  ;;  %v304_v41 = vld [vmem:[#allocation7 + $0x58] sm:$0xff]  ;;  %v306_v44 = vld [vmem:[#allocation7 + $0x68] sm:$0xff]  ;;  %v97_v47 = vld [vmem:[#allocation2 + $0x10] sm:$0xff] }
  0x65   :  { %v1307_v42 = vpack.c.bf16 %v304_v41, %v303_v40  ;;  %v96_v45 = vld [vmem:[#allocation2 + $0x8] sm:$0xff]  ;;  %v1311_v46 = vpack.c.bf16 %v306_v44, %v305_v43  ;;  %v98_v48 = vld [vmem:[#allocation2 + $0x18] sm:$0xff]  ;;  %v99_v49 = vld [vmem:[#allocation2 + $0x20] sm:$0xff] }
  0x66   :  { %1266 = vmatpush3.bf16.msra.mxu0 %v1263_v8  ;;  %1294 = vmatpush3.bf16.msra.mxu1 %v1291_v20  ;;  %v100_v50 = vld [vmem:[#allocation2 + $0x28] sm:$0xff]  ;;  %v101_v51 = vld [vmem:[#allocation2 + $0x30] sm:$0xff]  ;;  %v102_v52 = vld [vmem:[#allocation2 + $0x38] sm:$0xff] }
  0x67   :  { %1268 = vmatprep.subr.bf16.mxu0 %v1267_v12  ;;  %1296 = vmatprep.subr.bf16.mxu1 %v1295_v26  ;;  %v103_v53 = vld [vmem:[#allocation2 + $0x40] sm:$0xff]  ;;  %v104_v54 = vld [vmem:[#allocation2 + $0x48] sm:$0xff]  ;;  %v105_v55 = vld [vmem:[#allocation2 + $0x50] sm:$0xff] }
  0x68   :  { %v106_v56 = vld [vmem:[#allocation2 + $0x58] sm:$0xff]  ;;  %v107_v57 = vld [vmem:[#allocation2 + $0x60] sm:$0xff]  ;;  %v108_v58 = vld [vmem:[#allocation2 + $0x68] sm:$0xff] }
  0x69   :  { %v109_v59 = vld [vmem:[#allocation2 + $0x70] sm:$0xff]  ;;  %v110_v60 = vld [vmem:[#allocation2 + $0x78] sm:$0xff]  ;;  %v490_v0 = vld [vmem:[#allocation8] sm:$0xff] }
  0x6a   :  { %1270 = vmatpush3.bf16.msra.mxu0 %v1267_v12  ;;  %1298 = vmatpush3.bf16.msra.mxu1 %v1295_v26  ;;  %v307_v61 = vld [vmem:[#allocation7 + $0x70] sm:$0xff]  ;;  %v308_v62 = vld [vmem:[#allocation7 + $0x78] sm:$0xff]  ;;  %v491_v1 = vld [vmem:[#allocation8 + $0x8] sm:$0xff] }
  0x6b   :  { %1272 = vmatprep.subr.bf16.mxu0 %v1271_v21  ;;  %1300 = vmatprep.subr.bf16.mxu1 %v1299_v32  ;;  %v1315_v63 = vpack.c.bf16 %v308_v62, %v307_v61  ;;  %v492_v2 = vld [vmem:[#allocation8 + $0x10] sm:$0xff]  ;;  %v1319_v3 = vpack.c.bf16 %v491_v1, %v490_v0  ;;  %v493_v4 = vld [vmem:[#allocation8 + $0x18] sm:$0xff]  ;;  %v494_v6 = vld [vmem:[#allocation8 + $0x20] sm:$0xff] }
  0x6c   :  { %v1323_v5 = vpack.c.bf16 %v493_v4, %v492_v2  ;;  %v495_v7 = vld [vmem:[#allocation8 + $0x28] sm:$0xff]  ;;  %v496_v9 = vld [vmem:[#allocation8 + $0x30] sm:$0xff]  ;;  %v497_v10 = vld [vmem:[#allocation8 + $0x38] sm:$0xff] }
  0x6d   :  { %v1327_v8 = vpack.c.bf16 %v495_v7, %v494_v6  ;;  %v1331_v11 = vpack.c.bf16 %v497_v10, %v496_v9  ;;  %v498_v12 = vld [vmem:[#allocation8 + $0x40] sm:$0xff]  ;;  %v499_v13 = vld [vmem:[#allocation8 + $0x48] sm:$0xff]  ;;  %v500_v15 = vld [vmem:[#allocation8 + $0x50] sm:$0xff] }
  0x6e   :  { %1274 = vmatpush3.bf16.msra.mxu0 %v1271_v21  ;;  %1302 = vmatpush3.bf16.msra.mxu1 %v1299_v32  ;;  %v1335_v14 = vpack.c.bf16 %v499_v13, %v498_v12  ;;  %v501_v16 = vld [vmem:[#allocation8 + $0x58] sm:$0xff]  ;;  %v502_v18 = vld [vmem:[#allocation8 + $0x60] sm:$0xff]  ;;  %v503_v19 = vld [vmem:[#allocation8 + $0x68] sm:$0xff]  ;;  %v128_v21 = vlaneseq }
  0x6f   :  { %1276 = vmatprep.subr.bf16.mxu0 %v1275_v27  ;;  %1304 = vmatprep.subr.bf16.mxu1 %v1303_v38  ;;  %v1339_v17 = vpack.c.bf16 %v501_v16, %v500_v15  ;;  %v1343_v20 = vpack.c.bf16 %v503_v19, %v502_v18  ;;  %v1700_v24 = vld [vmem:[%s1762_s5] sm:$0xff]  ;;  %v504_v10 = vld [vmem:[#allocation8 + $0x70] sm:$0xff]  ;;  %s1563_s5 = smov [#allocation11]  }
  0x70   :  { %v1694_v22 = vshrl.u32 %v128_v21, 7  ;;  %v671_v13 = vld [vmem:[#allocation10] sm:$0xff]  ;;  %v673_v15 = vld [vmem:[#allocation10 + $0x10] sm:$0xff]  ;;  %s873_s27 = sshll.u32 %s1563_s5, 4  ;;  %s874_s27 = int_to_ptr.vmem [resolvable:$true] %s873_s27 }
  0x71   :  { %v675_v19 = vld [vmem:[#allocation10 + $0x20] sm:$0xff]  ;;  %s1502_s17 = scalar_lea.vmem %s874_s27, 2048  ;;  %p1507_p13 = scmp.lt.s32.totalorder %s874_s27, %s874_s27 }
  0x72   :  { %1278 = vmatpush3.bf16.msra.mxu0 %v1275_v27  ;;  %1306 = vmatpush3.bf16.msra.mxu1 %v1303_v38  ;;  %v130_v23 = vsub.s32 0, %v1694_v22  ;;  %p1503_p12 = scmp.ne.s32.totalorder %s874_s27, %s1502_s17  ;;  %p1508_p0 = scmp.lt.s32.totalorder %s1502_s17, %s1502_s17 }
  0x73   :  { %1280 = vmatprep.subr.bf16.mxu0 %v1279_v33  ;;  %1308 = vmatprep.subr.bf16.mxu1 %v1307_v42 }
  0x74   :  { %v131_v25 = vrot.slane %v1700_v24, %v130_v23  ;;  %v677_v23 = vld [vmem:[#allocation10 + $0x30] sm:$0xff]  ;;  %p1509_p1 = por %p1508_p0, %p1507_p13 }
  0x76   :  { %1282 = vmatpush3.bf16.msra.mxu0 %v1279_v33  ;;  %1310 = vmatpush3.bf16.msra.mxu1 %v1307_v42  ;;  %p1510_p2 = pnand %p1509_p1, %p1503_p12 }
  0x77   :  { %1284 = vmatprep.subr.bf16.mxu0 %v1283_v39  ;;  %1312 = vmatprep.subr.bf16.mxu1 %v1311_v46 }
  0x7a   :  { %1286 = vmatpush3.bf16.msra.mxu0 %v1283_v39  ;;  %1314 = vmatpush3.bf16.msra.mxu1 %v1311_v46 }
  0x7b   :  { %1316 = vmatprep.subr.bf16.mxu1 %v1315_v63  ;;  %1320 = vmatprep.subr.bf16.mxu0 %v1319_v3 }
  0x7d   :  { %1064 = vmatmul.mubr.f32.vlgmr.msra.gmra.mrb[0].mxu0 %v96_v45 }
  0x7e   :  { %1066 = vmatprep.mubr.f32.mxu0 %v97_v47  ;;  %1318 = vmatpush3.bf16.msra.mxu1 %v1315_v63 }
  0x7f   :  { %1322 = vmatpush3.bf16.msra.mxu0 %v1319_v3 }
  0x80   :  { %1324 = vmatprep.subr.bf16.mxu0 %v1323_v5 }
  0x81   :  { %1067 = vmatmul.mubr.f32.gmra.mrb[2].mxu0 %v98_v48 }
  0x82   :  { %1069 = vmatprep.mubr.f32.mxu0 %v99_v49 }
  0x83   :  { %1326 = vmatpush3.bf16.msra.mxu0 %v1323_v5 }
  0x84   :  { %1328 = vmatprep.subr.bf16.mxu0 %v1327_v8 }
  0x85   :  { %1070 = vmatmul.mubr.f32.gmra.mrb[4].mxu0 %v100_v50 }
  0x86   :  { %1072 = vmatprep.mubr.f32.mxu0 %v101_v51 }
  0x87   :  { %1330 = vmatpush3.bf16.msra.mxu0 %v1327_v8 }
  0x88   :  { %1332 = vmatprep.subr.bf16.mxu0 %v1331_v11 }
  0x89   :  { %1073 = vmatmul.mubr.f32.gmra.mrb[6].mxu0 %v102_v52 }
  0x8a   :  { %1075 = vmatprep.mubr.f32.mxu0 %v103_v53 }
  0x8b   :  { %1334 = vmatpush3.bf16.msra.mxu0 %v1331_v11  ;;  %v505_v11 = vld [vmem:[#allocation8 + $0x78] sm:$0xff] }
  0x8c   :  { %1336 = vmatprep.subr.bf16.mxu0 %v1335_v14  ;;  %v1347_v12 = vpack.c.bf16 %v505_v11, %v504_v10 }
  0x8d   :  { %1076 = vmatmul.mubr.f32.gmra.mrb[8].mxu0 %v104_v54 }
  0x8e   :  { %1078 = vmatprep.mubr.f32.mxu0 %v105_v55 }
  0x8f   :  { %1338 = vmatpush3.bf16.msra.mxu0 %v1335_v14  ;;  %v672_v14 = vld [vmem:[#allocation10 + $0x8] sm:$0xff] }
  0x90   :  { %1340 = vmatprep.subr.bf16.mxu0 %v1339_v17  ;;  %v1351_v16 = vpack.c.bf16 %v672_v14, %v671_v13 }
  0x91   :  { %1079 = vmatmul.mubr.f32.gmra.mrb[10].mxu0 %v106_v56 }
  0x92   :  { %1081 = vmatprep.mubr.f32.mxu0 %v107_v57  ;;  %1352 = vmatprep.subr.bf16.mxu1 %v1351_v16 }
  0x93   :  { %1342 = vmatpush3.bf16.msra.mxu0 %v1339_v17  ;;  %v674_v17 = vld [vmem:[#allocation10 + $0x18] sm:$0xff] }
  0x94   :  { %1344 = vmatprep.subr.bf16.mxu0 %v1343_v20  ;;  %v1355_v18 = vpack.c.bf16 %v674_v17, %v673_v15 }
  0x95   :  { %1082 = vmatmul.mubr.f32.gmra.mrb[12].mxu0 %v108_v58 }
  0x96   :  { %1084 = vmatprep.mubr.f32.mxu0 %v109_v59 }
  0x97   :  { %1346 = vmatpush3.bf16.msra.mxu0 %v1343_v20  ;;  %v676_v20 = vld [vmem:[#allocation10 + $0x28] sm:$0xff] }
  0x98   :  { %1348 = vmatprep.subr.bf16.mxu0 %v1347_v12  ;;  %v1359_v21 = vpack.c.bf16 %v676_v20, %v675_v19 }
  0x99   :  { %1085 = vmatmul.mubr.f32.gmra.mrb[14].mxu0 %v110_v60 }
  0x9b   :  { %1350 = vmatpush3.bf16.msra.mxu0 %v1347_v12 }
 0x150   :  { %v1065_v26 = vpop.f32.mrb[0].mxu0 }
 0x151   :  { %v204_v27 = vadd.f32 %v1065_v26, %v131_v25  ;;  %v198_v28 = vpop.f32.mrb[1].mxu0 }
 0x152   :  { %v199_v29 = vadd.f32 %v198_v28, %v131_v25  ;;  %v680_v28 = vld [vmem:[#allocation10 + $0x48] sm:$0xff] }
 0x153   :  { %v278_v32 = vmax.f32 %v204_v27, 0.0  ;;  %v679_v27 = vld [vmem:[#allocation10 + $0x40] sm:$0xff] }
 0x154   :  { %v1068_v30 = vpop.f32.mrb[2].mxu0  ;;  %v277_v31 = vmax.f32 %v199_v29, 0.0  ;;  %v1367_v29 = vpack.c.bf16 %v680_v28, %v679_v27  ;;  %v508_v27 = vsub.s32 2, %v1694_v22 }
 0x155   :  { %v214_v33 = vadd.f32 %v1068_v30, %v131_v25  ;;  %v208_v34 = vpop.f32.mrb[3].mxu0  ;;  %v681_v30 = vld [vmem:[#allocation10 + $0x50] sm:$0xff] }
 0x156   :  { %v209_v35 = vadd.f32 %v208_v34, %v131_v25  ;;  %1119 = vmatprep.mubr.f32.mxu1 %v277_v31  ;;  %v682_v31 = vld [vmem:[#allocation10 + $0x58] sm:$0xff]  ;;  %v684_v34 = vld [vmem:[#allocation10 + $0x68] sm:$0xff]  ;;  %v509_v28 = vrot.slane %v1700_v24, %v508_v27 }
 0x157   :  { %1120 = vmatmul.mubr.f32.vlgmr.msra.gmra.mrb[0].mxu1 %v278_v32  ;;  %v280_v38 = vmax.f32 %v214_v33, 0.0  ;;  %v1371_v32 = vpack.c.bf16 %v682_v31, %v681_v30  ;;  %v683_v33 = vld [vmem:[#allocation10 + $0x60] sm:$0xff] }
 0x158   :  { %v279_v36 = vmax.f32 %v209_v35, 0.0  ;;  %v1071_v37 = vpop.f32.mrb[4].mxu0  ;;  %1354 = vmatpush3.bf16.msra.mxu1 %v1351_v16  ;;  %v1375_v35 = vpack.c.bf16 %v684_v34, %v683_v33 }
 0x159   :  { %v224_v39 = vadd.f32 %v1071_v37, %v131_v25  ;;  %v218_v40 = vpop.f32.mrb[5].mxu0  ;;  %1356 = vmatprep.subr.bf16.mxu1 %v1355_v18 }
 0x15a   :  { %v219_v41 = vadd.f32 %v218_v40, %v131_v25  ;;  %1122 = vmatprep.mubr.f32.mxu1 %v279_v36  ;;  %v311_v36 = vsub.s32 1, %v1694_v22 }
 0x15b   :  { %1123 = vmatmul.mubr.f32.gmra.mrb[2].mxu1 %v280_v38  ;;  %v282_v44 = vmax.f32 %v224_v39, 0.0 }
 0x15c   :  { %v281_v42 = vmax.f32 %v219_v41, 0.0  ;;  %v1074_v43 = vpop.f32.mrb[6].mxu0  ;;  %1358 = vmatpush3.bf16.msra.mxu1 %v1355_v18  ;;  %v1705_v37 = vrot.slane %v1700_v24, %v311_v36 }
 0x15d   :  { %v234_v45 = vadd.f32 %v1074_v43, %v131_v25  ;;  %v228_v46 = vpop.f32.mrb[7].mxu0  ;;  %1360 = vmatprep.subr.bf16.mxu1 %v1359_v21 }
 0x15e   :  { %v229_v47 = vadd.f32 %v228_v46, %v131_v25  ;;  %1125 = vmatprep.mubr.f32.mxu1 %v281_v42 }
 0x15f   :  { %1126 = vmatmul.mubr.f32.gmra.mrb[4].mxu1 %v282_v44  ;;  %v284_v50 = vmax.f32 %v234_v45, 0.0 }
 0x160   :  { %v283_v48 = vmax.f32 %v229_v47, 0.0  ;;  %v1077_v49 = vpop.f32.mrb[8].mxu0  ;;  %1362 = vmatpush3.bf16.msra.mxu1 %v1359_v21 }
 0x161   :  { %v244_v51 = vadd.f32 %v1077_v49, %v131_v25  ;;  %v238_v52 = vpop.f32.mrb[9].mxu0 }
 0x162   :  { %v239_v53 = vadd.f32 %v238_v52, %v131_v25  ;;  %1128 = vmatprep.mubr.f32.mxu1 %v283_v48 }
 0x163   :  { %1129 = vmatmul.mubr.f32.gmra.mrb[6].mxu1 %v284_v50  ;;  %v286_v56 = vmax.f32 %v244_v51, 0.0 }
 0x164   :  { %v285_v54 = vmax.f32 %v239_v53, 0.0  ;;  %v1080_v55 = vpop.f32.mrb[10].mxu0 }
 0x165   :  { %v254_v57 = vadd.f32 %v1080_v55, %v131_v25  ;;  %v248_v58 = vpop.f32.mrb[11].mxu0 }
 0x166   :  { %v249_v59 = vadd.f32 %v248_v58, %v131_v25  ;;  %1131 = vmatprep.mubr.f32.mxu1 %v285_v54 }
 0x167   :  { %1132 = vmatmul.mubr.f32.gmra.mrb[8].mxu1 %v286_v56  ;;  %v288_v62 = vmax.f32 %v254_v57, 0.0 }
 0x168   :  { %v287_v60 = vmax.f32 %v249_v59, 0.0  ;;  %v1083_v61 = vpop.f32.mrb[12].mxu0 }
 0x169   :  { %v264_v63 = vadd.f32 %v1083_v61, %v131_v25  ;;  %v258_v0 = vpop.f32.mrb[13].mxu0 }
 0x16a   :  { %v259_v1 = vadd.f32 %v258_v0, %v131_v25  ;;  %1134 = vmatprep.mubr.f32.mxu1 %v287_v60 }
 0x16b   :  { %1135 = vmatmul.mubr.f32.gmra.mrb[10].mxu1 %v288_v62  ;;  %v290_v4 = vmax.f32 %v264_v63, 0.0 }
 0x16c   :  { %v289_v2 = vmax.f32 %v259_v1, 0.0  ;;  %v1086_v3 = vpop.f32.mrb[14].mxu0 }
 0x16d   :  { %v274_v5 = vadd.f32 %v1086_v3, %v131_v25  ;;  %v268_v6 = vpop.f32.mrb[15].mxu0 }
 0x16e   :  { %v269_v7 = vadd.f32 %v268_v6, %v131_v25  ;;  %1137 = vmatprep.mubr.f32.mxu1 %v289_v2  ;;  %v678_v25 = vld [vmem:[#allocation10 + $0x38] sm:$0xff] }
 0x16f   :  { %1138 = vmatmul.mubr.f32.gmra.mrb[12].mxu1 %v290_v4  ;;  %v292_v9 = vmax.f32 %v274_v5, 0.0  ;;  %v1363_v26 = vpack.c.bf16 %v678_v25, %v677_v23  ;;  %v685_v23 = vld [vmem:[#allocation10 + $0x70] sm:$0xff]  ;;  %v686_v25 = vld [vmem:[#allocation10 + $0x78] sm:$0xff] }
 0x170   :  { %v291_v8 = vmax.f32 %v269_v7, 0.0 }
 0x171   :  { %1364 = vmatprep.subr.bf16.mxu1 %v1363_v26 }
 0x172   :  { %1140 = vmatprep.mubr.f32.mxu1 %v291_v8  ;;  %1366 = vmatpush3.bf16.msra.mxu1 %v1363_v26  ;;  %v1379_v26 = vpack.c.bf16 %v686_v25, %v685_v23 }
 0x173   :  { %1141 = vmatmul.mubr.f32.gmra.mrb[14].mxu1 %v292_v9  ;;  %1368 = vmatprep.subr.bf16.mxu1 %v1367_v29 }
 0x176   :  { %1370 = vmatpush3.bf16.msra.mxu1 %v1367_v29 }
 0x177   :  { %1372 = vmatprep.subr.bf16.mxu1 %v1371_v32 }
 0x17a   :  { %1374 = vmatpush3.bf16.msra.mxu1 %v1371_v32 }
 0x17b   :  { %1376 = vmatprep.subr.bf16.mxu1 %v1375_v35 }
 0x17e   :  { %1378 = vmatpush3.bf16.msra.mxu1 %v1375_v35 }
 0x17f   :  { %1380 = vmatprep.subr.bf16.mxu1 %v1379_v26 }
 0x182   :  { %1382 = vmatpush3.bf16.msra.mxu1 %v1379_v26 }
 0x22a   :  { %v1121_v38 = vpop.f32.mrb[0].mxu1 }
 0x22b   :  { %v385_v39 = vadd.f32 %v1121_v38, %v1705_v37  ;;  %v379_v40 = vpop.f32.mrb[1].mxu1 }
 0x22c   :  { %v380_v41 = vadd.f32 %v379_v40, %v1705_v37 }
 0x22d   :  { %v459_v42 = vmax.f32 %v385_v39, 0.0 }
 0x22e   :  { %v458_v43 = vmax.f32 %v380_v41, 0.0  ;;  %v1124_v44 = vpop.f32.mrb[2].mxu1 }
 0x22f   :  { %475 = vst [vmem:[#allocation11 + $0x8] sm:$0xff] %v459_v42  ;;  %v395_v45 = vadd.f32 %v1124_v44, %v1705_v37  ;;  %v389_v46 = vpop.f32.mrb[3].mxu1 }
 0x230   :  { %474 = vst [vmem:[#allocation11] sm:$0xff] %v458_v43  ;;  %v390_v47 = vadd.f32 %v389_v46, %v1705_v37  ;;  %1175 = vmatprep.mubr.f32.mxu0 %v458_v43 }
 0x231   :  { %v461_v48 = vmax.f32 %v395_v45, 0.0  ;;  %1176 = vmatmul.mubr.f32.vlgmr.msra.gmra.mrb[16].mxu0 %v459_v42 }
 0x232   :  { %v460_v49 = vmax.f32 %v390_v47, 0.0  ;;  %v1127_v50 = vpop.f32.mrb[4].mxu1 }
 0x233   :  { %477 = vst [vmem:[#allocation11 + $0x18] sm:$0xff] %v461_v48  ;;  %v405_v51 = vadd.f32 %v1127_v50, %v1705_v37  ;;  %v399_v52 = vpop.f32.mrb[5].mxu1 }
 0x234   :  { %476 = vst [vmem:[#allocation11 + $0x10] sm:$0xff] %v460_v49  ;;  %v400_v53 = vadd.f32 %v399_v52, %v1705_v37  ;;  %1178 = vmatprep.mubr.f32.mxu0 %v460_v49 }
 0x235   :  { %v463_v54 = vmax.f32 %v405_v51, 0.0  ;;  %1179 = vmatmul.mubr.f32.gmra.mrb[18].mxu0 %v461_v48 }
 0x236   :  { %v462_v55 = vmax.f32 %v400_v53, 0.0  ;;  %v1130_v56 = vpop.f32.mrb[6].mxu1 }
 0x237   :  { %479 = vst [vmem:[#allocation11 + $0x28] sm:$0xff] %v463_v54  ;;  %v415_v57 = vadd.f32 %v1130_v56, %v1705_v37  ;;  %v409_v58 = vpop.f32.mrb[7].mxu1 }
 0x238   :  { %478 = vst [vmem:[#allocation11 + $0x20] sm:$0xff] %v462_v55  ;;  %v410_v59 = vadd.f32 %v409_v58, %v1705_v37  ;;  %1181 = vmatprep.mubr.f32.mxu0 %v462_v55 }
 0x239   :  { %v465_v60 = vmax.f32 %v415_v57, 0.0  ;;  %1182 = vmatmul.mubr.f32.gmra.mrb[20].mxu0 %v463_v54 }
 0x23a   :  { %v464_v61 = vmax.f32 %v410_v59, 0.0  ;;  %v1133_v62 = vpop.f32.mrb[8].mxu1 }
 0x23b   :  { %481 = vst [vmem:[#allocation11 + $0x38] sm:$0xff] %v465_v60  ;;  %v425_v63 = vadd.f32 %v1133_v62, %v1705_v37  ;;  %v419_v0 = vpop.f32.mrb[9].mxu1 }
 0x23c   :  { %480 = vst [vmem:[#allocation11 + $0x30] sm:$0xff] %v464_v61  ;;  %v420_v1 = vadd.f32 %v419_v0, %v1705_v37  ;;  %1184 = vmatprep.mubr.f32.mxu0 %v464_v61 }
 0x23d   :  { %v467_v2 = vmax.f32 %v425_v63, 0.0  ;;  %1185 = vmatmul.mubr.f32.gmra.mrb[22].mxu0 %v465_v60 }
 0x23e   :  { %v466_v3 = vmax.f32 %v420_v1, 0.0  ;;  %v1136_v4 = vpop.f32.mrb[10].mxu1 }
 0x23f   :  { %483 = vst [vmem:[#allocation11 + $0x48] sm:$0xff] %v467_v2  ;;  %v435_v5 = vadd.f32 %v1136_v4, %v1705_v37  ;;  %v429_v6 = vpop.f32.mrb[11].mxu1 }
 0x240   :  { %482 = vst [vmem:[#allocation11 + $0x40] sm:$0xff] %v466_v3  ;;  %v430_v7 = vadd.f32 %v429_v6, %v1705_v37  ;;  %1187 = vmatprep.mubr.f32.mxu0 %v466_v3 }
 0x241   :  { %v469_v8 = vmax.f32 %v435_v5, 0.0  ;;  %1188 = vmatmul.mubr.f32.gmra.mrb[24].mxu0 %v467_v2 }
 0x242   :  { %v468_v9 = vmax.f32 %v430_v7, 0.0  ;;  %v1139_v10 = vpop.f32.mrb[12].mxu1 }
 0x243   :  { %485 = vst [vmem:[#allocation11 + $0x58] sm:$0xff] %v469_v8  ;;  %v445_v11 = vadd.f32 %v1139_v10, %v1705_v37  ;;  %v439_v12 = vpop.f32.mrb[13].mxu1 }
 0x244   :  { %484 = vst [vmem:[#allocation11 + $0x50] sm:$0xff] %v468_v9  ;;  %v440_v13 = vadd.f32 %v439_v12, %v1705_v37  ;;  %1190 = vmatprep.mubr.f32.mxu0 %v468_v9 }
 0x245   :  { %v471_v14 = vmax.f32 %v445_v11, 0.0  ;;  %1191 = vmatmul.mubr.f32.gmra.mrb[26].mxu0 %v469_v8 }
 0x246   :  { %v470_v15 = vmax.f32 %v440_v13, 0.0  ;;  %v1142_v16 = vpop.f32.mrb[14].mxu1 }
 0x247   :  { %487 = vst [vmem:[#allocation11 + $0x68] sm:$0xff] %v471_v14  ;;  %v455_v17 = vadd.f32 %v1142_v16, %v1705_v37  ;;  %v449_v18 = vpop.f32.mrb[15].mxu1 }
 0x248   :  { %486 = vst [vmem:[#allocation11 + $0x60] sm:$0xff] %v470_v15  ;;  %v450_v19 = vadd.f32 %v449_v18, %v1705_v37  ;;  %1193 = vmatprep.mubr.f32.mxu0 %v470_v15 }
 0x249   :  { %v473_v20 = vmax.f32 %v455_v17, 0.0  ;;  %1194 = vmatmul.mubr.f32.gmra.mrb[28].mxu0 %v471_v14 }
 0x24a   :  { %v472_v21 = vmax.f32 %v450_v19, 0.0 }
 0x24b   :  { %489 = vst [vmem:[#allocation11 + $0x78] sm:$0xff] %v473_v20 }
 0x24c   :  { %488 = vst [vmem:[#allocation11 + $0x70] sm:$0xff] %v472_v21  ;;  %1196 = vmatprep.mubr.f32.mxu0 %v472_v21 }
 0x24d   :  { %1197 = vmatmul.mubr.f32.gmra.mrb[30].mxu0 %v473_v20 }
 0x304   :  { %v1177_v29 = vpop.f32.mrb[16].mxu0 }
 0x305   :  { %v582_v30 = vadd.f32 %v1177_v29, %v509_v28  ;;  %v576_v31 = vpop.f32.mrb[17].mxu0 }
 0x306   :  { %v577_v32 = vadd.f32 %v576_v31, %v509_v28 }
 0x307   :  { %v656_v35 = vmax.f32 %v582_v30, 0.0 }
 0x308   :  { %v655_v33 = vmax.f32 %v577_v32, 0.0  ;;  %v1180_v34 = vpop.f32.mrb[18].mxu0 }
 0x309   :  { %v592_v36 = vadd.f32 %v1180_v34, %v509_v28  ;;  %v586_v37 = vpop.f32.mrb[19].mxu0 }
 0x30a   :  { %v587_v38 = vadd.f32 %v586_v37, %v509_v28  ;;  %1231 = vmatprep.mubr.f32.mxu1 %v655_v33 }
 0x30b   :  { %1232 = vmatmul.mubr.f32.vlgmr.msra.gmra.mrb[16].mxu1 %v656_v35  ;;  %v658_v41 = vmax.f32 %v592_v36, 0.0 }
 0x30c   :  { %v657_v39 = vmax.f32 %v587_v38, 0.0  ;;  %v1183_v40 = vpop.f32.mrb[20].mxu0 }
 0x30d   :  { %v602_v42 = vadd.f32 %v1183_v40, %v509_v28  ;;  %v596_v43 = vpop.f32.mrb[21].mxu0 }
 0x30e   :  { %v597_v44 = vadd.f32 %v596_v43, %v509_v28  ;;  %1234 = vmatprep.mubr.f32.mxu1 %v657_v39 }
 0x30f   :  { %1235 = vmatmul.mubr.f32.gmra.mrb[18].mxu1 %v658_v41  ;;  %v660_v47 = vmax.f32 %v602_v42, 0.0 }
 0x310   :  { %v659_v45 = vmax.f32 %v597_v44, 0.0  ;;  %v1186_v46 = vpop.f32.mrb[22].mxu0 }
 0x311   :  { %v612_v48 = vadd.f32 %v1186_v46, %v509_v28  ;;  %v606_v49 = vpop.f32.mrb[23].mxu0 }
 0x312   :  { %v607_v50 = vadd.f32 %v606_v49, %v509_v28  ;;  %1237 = vmatprep.mubr.f32.mxu1 %v659_v45 }
 0x313   :  { %1238 = vmatmul.mubr.f32.gmra.mrb[20].mxu1 %v660_v47  ;;  %v662_v53 = vmax.f32 %v612_v48, 0.0 }
 0x314   :  { %v661_v51 = vmax.f32 %v607_v50, 0.0  ;;  %v1189_v52 = vpop.f32.mrb[24].mxu0 }
 0x315   :  { %v622_v54 = vadd.f32 %v1189_v52, %v509_v28  ;;  %v616_v55 = vpop.f32.mrb[25].mxu0 }
 0x316   :  { %v617_v56 = vadd.f32 %v616_v55, %v509_v28  ;;  %1240 = vmatprep.mubr.f32.mxu1 %v661_v51 }
 0x317   :  { %1241 = vmatmul.mubr.f32.gmra.mrb[22].mxu1 %v662_v53  ;;  %v664_v59 = vmax.f32 %v622_v54, 0.0 }
 0x318   :  { %v663_v57 = vmax.f32 %v617_v56, 0.0  ;;  %v1192_v58 = vpop.f32.mrb[26].mxu0 }
 0x319   :  { %v632_v60 = vadd.f32 %v1192_v58, %v509_v28  ;;  %v626_v61 = vpop.f32.mrb[27].mxu0 }
 0x31a   :  { %v627_v62 = vadd.f32 %v626_v61, %v509_v28  ;;  %1243 = vmatprep.mubr.f32.mxu1 %v663_v57 }
 0x31b   :  { %1244 = vmatmul.mubr.f32.gmra.mrb[24].mxu1 %v664_v59  ;;  %v666_v1 = vmax.f32 %v632_v60, 0.0 }
 0x31c   :  { %v665_v63 = vmax.f32 %v627_v62, 0.0  ;;  %v1195_v0 = vpop.f32.mrb[28].mxu0 }
 0x31d   :  { %v642_v2 = vadd.f32 %v1195_v0, %v509_v28  ;;  %v636_v3 = vpop.f32.mrb[29].mxu0 }
 0x31e   :  { %v637_v4 = vadd.f32 %v636_v3, %v509_v28  ;;  %1246 = vmatprep.mubr.f32.mxu1 %v665_v63 }
 0x31f   :  { %1247 = vmatmul.mubr.f32.gmra.mrb[26].mxu1 %v666_v1  ;;  %v668_v7 = vmax.f32 %v642_v2, 0.0 }
 0x320   :  { %v667_v5 = vmax.f32 %v637_v4, 0.0  ;;  %v1198_v6 = vpop.f32.mrb[30].mxu0 }
 0x321   :  { %v652_v8 = vadd.f32 %v1198_v6, %v509_v28  ;;  %v646_v9 = vpop.f32.mrb[31].mxu0 }
 0x322   :  { %v647_v10 = vadd.f32 %v646_v9, %v509_v28  ;;  %1249 = vmatprep.mubr.f32.mxu1 %v667_v5 }
 0x323   :  { %1250 = vmatmul.mubr.f32.gmra.mrb[28].mxu1 %v668_v7  ;;  %v670_v12 = vmax.f32 %v652_v8, 0.0 }
 0x324   :  { %v669_v11 = vmax.f32 %v647_v10, 0.0 }
 0x326   :  { %1252 = vmatprep.mubr.f32.mxu1 %v669_v11 }
 0x327   :  { %1253 = vmatmul.mubr.f32.gmra.mrb[30].mxu1 %v670_v12 }
 0x328   :  { %1513 = shalt.err (!%p1510_p2)
}
 0x329   :  { %s1514_s20 = scalar_lea.hbm %s1763_s6, 2048 }
 0x32a   :  { %p1515_p3 = scmp.ne.s32.totalorder %s1763_s6, %s1514_s20  ;;  %p1518_p4 = scmp.lt.u32.totalorder %s1514_s20, %s1763_s6 }
 0x32c   :  { %p1520_p5 = pnand %p1518_p4, %p1515_p3 }
 0x32e   :  { %1523 = shalt.err (!%p1520_p5)
}
 0x32f   :  { %879 = dma.vmem_to_hbm [thread:$0]  %s874_s27, 2048, %s1763_s6, [#allocation4], %s1558_s13, %s1558_s13, %s1559_s14   ;;  %v689_v13 = vsub.s32 3, %v1694_v22 }
 0x330   :  { %s1564_s6 = smov [#allocation12]  }
 0x331   :  { %v690_v14 = vrot.slane %v1700_v24, %v689_v13  ;;  %s885_s25 = sshll.u32 %s1564_s6, 4  ;;  %s886_s25 = int_to_ptr.vmem [resolvable:$true] %s885_s25 }
 0x332   :  { %s1524_s26 = scalar_lea.vmem %s886_s25, 2048  ;;  %p1529_p7 = scmp.lt.s32.totalorder %s886_s25, %s886_s25 }
 0x333   :  { %p1525_p6 = scmp.ne.s32.totalorder %s886_s25, %s1524_s26  ;;  %p1530_p8 = scmp.lt.s32.totalorder %s1524_s26, %s1524_s26 }
 0x335   :  { %p1531_p9 = por %p1530_p8, %p1529_p7 }
 0x337   :  { %p1532_p10 = pnand %p1531_p9, %p1525_p6 }
 0x3de   :  { %v1233_v15 = vpop.f32.mrb[16].mxu1 }
 0x3df   :  { %v763_v16 = vadd.f32 %v1233_v15, %v690_v14  ;;  %v757_v17 = vpop.f32.mrb[17].mxu1 }
 0x3e0   :  { %v758_v18 = vadd.f32 %v757_v17, %v690_v14 }
 0x3e1   :  { %v837_v19 = vmax.f32 %v763_v16, 0.0 }
 0x3e2   :  { %v836_v20 = vmax.f32 %v758_v18, 0.0  ;;  %v1236_v21 = vpop.f32.mrb[18].mxu1 }
 0x3e3   :  { %853 = vst [vmem:[#allocation12 + $0x8] sm:$0xff] %v837_v19  ;;  %v773_v23 = vadd.f32 %v1236_v21, %v690_v14  ;;  %v767_v25 = vpop.f32.mrb[19].mxu1 }
 0x3e4   :  { %852 = vst [vmem:[#allocation12] sm:$0xff] %v836_v20  ;;  %v768_v26 = vadd.f32 %v767_v25, %v690_v14 }
 0x3e5   :  { %v839_v27 = vmax.f32 %v773_v23, 0.0 }
 0x3e6   :  { %v838_v28 = vmax.f32 %v768_v26, 0.0  ;;  %v1239_v29 = vpop.f32.mrb[20].mxu1 }
 0x3e7   :  { %855 = vst [vmem:[#allocation12 + $0x18] sm:$0xff] %v839_v27  ;;  %v783_v30 = vadd.f32 %v1239_v29, %v690_v14  ;;  %v777_v22 = vpop.f32.mrb[21].mxu1 }
 0x3e8   :  { %854 = vst [vmem:[#allocation12 + $0x10] sm:$0xff] %v838_v28  ;;  %v778_v24 = vadd.f32 %v777_v22, %v690_v14 }
 0x3e9   :  { %v841_v31 = vmax.f32 %v783_v30, 0.0 }
 0x3ea   :  { %v840_v32 = vmax.f32 %v778_v24, 0.0  ;;  %v1242_v33 = vpop.f32.mrb[22].mxu1 }
 0x3eb   :  { %857 = vst [vmem:[#allocation12 + $0x28] sm:$0xff] %v841_v31  ;;  %v793_v34 = vadd.f32 %v1242_v33, %v690_v14  ;;  %v787_v35 = vpop.f32.mrb[23].mxu1 }
 0x3ec   :  { %856 = vst [vmem:[#allocation12 + $0x20] sm:$0xff] %v840_v32  ;;  %v788_v36 = vadd.f32 %v787_v35, %v690_v14 }
 0x3ed   :  { %v843_v37 = vmax.f32 %v793_v34, 0.0 }
 0x3ee   :  { %v842_v38 = vmax.f32 %v788_v36, 0.0  ;;  %v1245_v39 = vpop.f32.mrb[24].mxu1 }
 0x3ef   :  { %859 = vst [vmem:[#allocation12 + $0x38] sm:$0xff] %v843_v37  ;;  %v803_v40 = vadd.f32 %v1245_v39, %v690_v14  ;;  %v797_v41 = vpop.f32.mrb[25].mxu1 }
 0x3f0   :  { %858 = vst [vmem:[#allocation12 + $0x30] sm:$0xff] %v842_v38  ;;  %v798_v42 = vadd.f32 %v797_v41, %v690_v14 }
 0x3f1   :  { %v845_v43 = vmax.f32 %v803_v40, 0.0 }
 0x3f2   :  { %v844_v44 = vmax.f32 %v798_v42, 0.0  ;;  %v1248_v45 = vpop.f32.mrb[26].mxu1 }
 0x3f3   :  { %861 = vst [vmem:[#allocation12 + $0x48] sm:$0xff] %v845_v43  ;;  %v813_v46 = vadd.f32 %v1248_v45, %v690_v14  ;;  %v807_v47 = vpop.f32.mrb[27].mxu1 }
 0x3f4   :  { %860 = vst [vmem:[#allocation12 + $0x40] sm:$0xff] %v844_v44  ;;  %v808_v48 = vadd.f32 %v807_v47, %v690_v14 }
 0x3f5   :  { %v847_v49 = vmax.f32 %v813_v46, 0.0 }
 0x3f6   :  { %v846_v50 = vmax.f32 %v808_v48, 0.0  ;;  %v1251_v51 = vpop.f32.mrb[28].mxu1 }
 0x3f7   :  { %863 = vst [vmem:[#allocation12 + $0x58] sm:$0xff] %v847_v49  ;;  %v823_v52 = vadd.f32 %v1251_v51, %v690_v14  ;;  %v817_v53 = vpop.f32.mrb[29].mxu1 }
 0x3f8   :  { %862 = vst [vmem:[#allocation12 + $0x50] sm:$0xff] %v846_v50  ;;  %v818_v54 = vadd.f32 %v817_v53, %v690_v14 }
 0x3f9   :  { %v849_v55 = vmax.f32 %v823_v52, 0.0 }
 0x3fa   :  { %v848_v56 = vmax.f32 %v818_v54, 0.0  ;;  %v1254_v57 = vpop.f32.mrb[30].mxu1 }
 0x3fb   :  { %865 = vst [vmem:[#allocation12 + $0x68] sm:$0xff] %v849_v55  ;;  %v833_v58 = vadd.f32 %v1254_v57, %v690_v14  ;;  %v827_v59 = vpop.f32.mrb[31].mxu1 }
 0x3fc   :  { %864 = vst [vmem:[#allocation12 + $0x60] sm:$0xff] %v848_v56  ;;  %v828_v60 = vadd.f32 %v827_v59, %v690_v14 }
 0x3fd   :  { %v851_v61 = vmax.f32 %v833_v58, 0.0 }
 0x3fe   :  { %v850_v62 = vmax.f32 %v828_v60, 0.0 }
 0x3ff   :  { %867 = vst [vmem:[#allocation12 + $0x78] sm:$0xff] %v851_v61 }
 0x400   :  { %866 = vst [vmem:[#allocation12 + $0x70] sm:$0xff] %v850_v62 }
 0x401   :  { %1535 = shalt.err (!%p1532_p10)
}
 0x402   :  { %s1536_s8 = scalar_lea.hbm %s1764_s7, 2048 }
 0x403   :  { %p1537_p11 = scmp.ne.s32.totalorder %s1764_s7, %s1536_s8  ;;  %p1540_p12 = scmp.lt.u32.totalorder %s1536_s8, %s1764_s7 }
 0x405   :  { %p1542_p13 = pnand %p1540_p12, %p1537_p11 }
 0x407   :  { %1545 = shalt.err (!%p1542_p13)
}
 0x408   :  { %891 = dma.vmem_to_hbm [thread:$0]  %s886_s25, 2048, %s1764_s7, [#allocation13], %s1558_s13, %s1558_s13, %s1559_s14  }
 0x409   :  { %1552 = dma.done.wait [#allocation4], 2048  }
 0x40a   :  { %1553 = vsyncadd [#allocation4], 4294965248 }
 0x40b   :  { %1554 = dma.done.wait [#allocation13], 2048  }
 0x40c   :  { %1555 = vsyncadd [#allocation13], 4294965248 }
 0x40d   :  { %898 = vsyncpa [#allocation3], 1 }
 0x40e   :  { %899 = vsyncpa [#allocation6], 1 }
 0x40f   :  { %900 = vsyncpa [#allocation9], 1 }
 0x410   :  { %901 = vsyncpa [#allocation4], 1 }
 0x411   :  { %902 = vsyncpa [#allocation13], 1 }

</bundles_post_ra>
